<compile_context>
chip_gen: v5e
topology: v5e:2x2
jax: 0.10.0
libtpu: 0.0.40
codegen_flags: <defaults>
</compile_context>

<pallas_src>
import jax
import jax.numpy as jnp
from jax.experimental import pallas as pl
from jax.experimental.pallas import tpu as pltpu

STATE_SIZE = 8     # config.STATE_SIZE
ACTION_SIZE = 4    # config.ACTION_SIZE
H1 = 50
H2 = 30

LANES = 128
S_PAD = ((STATE_SIZE + 7) // 8) * 8      # padded input feature dim (= 8 here)

# Row layout of the packed parameter slab (all offsets 8-sublane aligned).
R_W1 = 0                    # rows [0, S_PAD)        : fc1 weight (S_PAD, 128)
R_B1 = R_W1 + S_PAD         # row  R_B1              : fc1 bias   (1, 128)
R_W2 = R_B1 + 8             # rows [R_W2, R_W2+128)  : fc2 weight (128, 128)
R_B2 = R_W2 + LANES         # row  R_B2              : fc2 bias   (1, 128)
R_WA = R_B2 + 8             # rows [R_WA, R_WA+128)  : adv head weight (128, 128)
R_BA = R_WA + LANES         # row  R_BA              : adv head bias   (1, 128)
P_ROWS = R_BA + 8           # total slab rows (multiple of 8)


def dqn_kernel(x_ref, p_ref, out_ref):
    x = x_ref[...]                                   # (TB, S_PAD) f32

    w1 = p_ref[R_W1:R_W1 + S_PAD, :]                 # (S_PAD, 128)
    b1 = p_ref[R_B1:R_B1 + 1, :]                     # (1, 128)
    w2 = p_ref[R_W2:R_W2 + LANES, :]                 # (128, 128)
    b2 = p_ref[R_B2:R_B2 + 1, :]                     # (1, 128)
    wa = p_ref[R_WA:R_WA + LANES, :]                 # (128, 128)
    ba = p_ref[R_BA:R_BA + 1, :]                     # (1, 128)

    # fc1 + relu (padded lanes stay exactly zero: zero weights, zero bias)
    h1 = jnp.maximum(
        jnp.dot(x, w1, preferred_element_type=jnp.float32) + b1, 0.0)
    # fc2 + relu
    h2 = jnp.maximum(
        jnp.dot(h1, w2, preferred_element_type=jnp.float32) + b2, 0.0)
    # advantage head — lane-dense (TB, 128) output; real values in lanes [:ACTION_SIZE]
    adv = jnp.dot(h2, wa, preferred_element_type=jnp.float32) + ba
    out_ref[...] = adv


def pack_params(params):
    """Pack the 3 used layers into one zero-padded (P_ROWS, 128) f32 slab."""
    w1, b1, w2, b2, wa, ba = params[:6]   # state head (ws, bs) is dead code
    p = jnp.zeros((P_ROWS, LANES), jnp.float32)
    p = p.at[R_W1:R_W1 + STATE_SIZE, :H1].set(w1)
    p = p.at[R_B1, :H1].set(b1.reshape(-1))
    p = p.at[R_W2:R_W2 + H1, :H2].set(w2)
    p = p.at[R_B2, :H2].set(b2.reshape(-1))
    p = p.at[R_WA:R_WA + H2, :ACTION_SIZE].set(wa)
    p = p.at[R_BA, :ACTION_SIZE].set(ba.reshape(-1))
    return p


def dqn_forward(x, params, *, tile_batch=512):
    """x: (B, STATE_SIZE) f32 -> adv_value: (B, ACTION_SIZE) f32."""
    B = x.shape[0]
    p = pack_params(params)

    # Pad feature dim to S_PAD (no-op when STATE_SIZE == 8).
    if STATE_SIZE != S_PAD:
        x = jnp.pad(x, ((0, 0), (0, S_PAD - STATE_SIZE)))

    # Batch tile: big tiles for pipelining at large B, 8-row minimum alignment.
    if B >= tile_batch:
        tb = tile_batch
    else:
        tb = max(8, ((B + 7) // 8) * 8)
    bp = pl.cdiv(B, tb) * tb
    if bp != B:
        x = jnp.pad(x, ((0, bp - B), (0, 0)))

    out = pl.pallas_call(
        dqn_kernel,
        grid=(bp // tb,),
        in_specs=[
            pl.BlockSpec((tb, S_PAD), lambda i: (i, 0)),        # x: tiled over batch
            pl.BlockSpec((P_ROWS, LANES), lambda i: (0, 0)),    # params: VMEM-resident
        ],
        out_specs=pl.BlockSpec((tb, LANES), lambda i: (i, 0)),  # lane-dense output
        out_shape=jax.ShapeDtypeStruct((bp, LANES), jnp.float32),
        compiler_params=pltpu.CompilerParams(
            dimension_semantics=("parallel",)),
    )(x, p)
    return out[:B, :ACTION_SIZE]


def init_params(key):
    """Deterministic synthetic parameters.

    PyTorch nn.Linear stores W as (out, in); we keep (in, out) so the kernel
    computes x @ W + b directly.  fc1 weights ~ N(0, 0.1) as in the reference;
    remaining layers use uniform(-1/sqrt(fan_in), 1/sqrt(fan_in)).
    The state head (ws, bs) is produced for module fidelity but is dead code
    in forward() and is not consumed by the kernel.
    """
    ks = jax.random.split(key, 8)

    def uni(k, shape, fan_in):
        bound = 1.0 / jnp.sqrt(float(fan_in))
        return jax.random.uniform(k, shape, jnp.float32, -bound, bound)

    w1 = 0.1 * jax.random.normal(ks[0], (STATE_SIZE, H1), jnp.float32)
    b1 = uni(ks[1], (1, H1), STATE_SIZE)
    w2 = uni(ks[2], (H1, H2), H1)
    b2 = uni(ks[3], (1, H2), H1)
    wa = uni(ks[4], (H2, ACTION_SIZE), H2)
    ba = uni(ks[5], (1, ACTION_SIZE), H2)
    ws = uni(ks[6], (H2, 1), H2)          # dead head (forward returns adv)
    bs = uni(ks[7], (1, 1), H2)           # dead head
    return (w1, b1, w2, b2, wa, ba, ws, bs)


def dqn_reference(x, params):
    w1, b1, w2, b2, wa, ba, _ws, _bs = params
    h1 = jnp.maximum(x @ w1 + b1, 0.0)
    h2 = jnp.maximum(h1 @ w2 + b2, 0.0)
    return h2 @ wa + ba


if __name__ == "__main__":
    key = jax.random.PRNGKey(0)
    k_x, k_x2, k_p = jax.random.split(key, 3)
    params = init_params(k_p)

    # Small-batch check (single grid step, TB rounded to 8).
    batch = 2
    x = jax.random.normal(k_x, (batch, STATE_SIZE), jnp.float32)
    adv = jax.block_until_ready(dqn_forward(x, params))
    ref = dqn_reference(x, params)
    assert adv.shape == (batch, ACTION_SIZE)
    assert jnp.allclose(adv, ref, atol=1e-5, rtol=1e-5), "mismatch (B=2)"

    # Multi-tile check: exercises batch tiling, padding, and output slicing.
    batch2 = 40
    x2 = jax.random.normal(k_x2, (batch2, STATE_SIZE), jnp.float32)
    adv2 = jax.block_until_ready(dqn_forward(x2, params, tile_batch=16))
    ref2 = dqn_reference(x2, params)
    assert adv2.shape == (batch2, ACTION_SIZE)
    assert jnp.allclose(adv2, ref2, atol=1e-5, rtol=1e-5), "mismatch (B=40)"

    print("KERNEL_OK")
</pallas_src>

<mosaic_0001>
module attributes {stable_mosaic.version = 11 : i64} {
  func.func @dqn_kernel(%arg0: i32, %arg1: memref<8x8xf32, #tpu.memory_space<vmem>>, %arg2: memref<288x128xf32, #tpu.memory_space<vmem>>, %arg3: memref<8x128xf32, #tpu.memory_space<vmem>>) attributes {dimension_semantics = [#tpu.dimension_semantics<parallel>], iteration_bounds = array<i64: 1>, scalar_prefetch = 0 : i64, scratch_operands = 0 : i64, tpu.core_type = #tpu.core_type<tc>, window_params = [{transform_indices = @transform_0, window_bounds = array<i64: 8, 8>}, {pipeline_mode = #tpu.pipeline_mode<synchronous>, transform_indices = @transform_1, window_bounds = array<i64: 288, 128>}, {transform_indices = @transform_2, window_bounds = array<i64: 8, 128>}]} {
    %c0 = arith.constant 0 : index
    %c0_0 = arith.constant 0 : index
    %0 = vector.load %arg1[%c0, %c0_0] : memref<8x8xf32, #tpu.memory_space<vmem>>, vector<8x8xf32>
    %c0_1 = arith.constant 0 : index
    %c0_2 = arith.constant 0 : index
    %1 = vector.load %arg2[%c0_1, %c0_2] : memref<288x128xf32, #tpu.memory_space<vmem>>, vector<8x128xf32>
    %c8 = arith.constant 8 : index
    %c0_3 = arith.constant 0 : index
    %2 = vector.load %arg2[%c8, %c0_3] : memref<288x128xf32, #tpu.memory_space<vmem>>, vector<1x128xf32>
    %c16 = arith.constant 16 : index
    %c0_4 = arith.constant 0 : index
    %3 = vector.load %arg2[%c16, %c0_4] : memref<288x128xf32, #tpu.memory_space<vmem>>, vector<128x128xf32>
    %c144 = arith.constant 144 : index
    %c0_5 = arith.constant 0 : index
    %4 = vector.load %arg2[%c144, %c0_5] : memref<288x128xf32, #tpu.memory_space<vmem>>, vector<1x128xf32>
    %c152 = arith.constant 152 : index
    %c0_6 = arith.constant 0 : index
    %5 = vector.load %arg2[%c152, %c0_6] : memref<288x128xf32, #tpu.memory_space<vmem>>, vector<128x128xf32>
    %c280 = arith.constant 280 : index
    %c0_7 = arith.constant 0 : index
    %6 = vector.load %arg2[%c280, %c0_7] : memref<288x128xf32, #tpu.memory_space<vmem>>, vector<1x128xf32>
    %cst = arith.constant dense<0.000000e+00> : vector<8x128xf32>
    %7 = tpu.matmul %0, %1, %cst {dimension_numbers = #tpu.dot_dimension_numbers<[1], [0], [0], [1], [0, 0, 1, 1], [], []>} : vector<8x8xf32>, vector<8x128xf32>, vector<8x128xf32> -> vector<8x128xf32>
    %8 = vector.broadcast %2 : vector<1x128xf32> to vector<8x128xf32>
    %9 = arith.addf %7, %8 : vector<8x128xf32>
    %cst_8 = arith.constant 0.000000e+00 : f32
    %10 = vector.broadcast %cst_8 : f32 to vector<8x128xf32>
    %11 = arith.maximumf %9, %10 : vector<8x128xf32>
    %cst_9 = arith.constant dense<0.000000e+00> : vector<8x128xf32>
    %12 = tpu.matmul %11, %3, %cst_9 {dimension_numbers = #tpu.dot_dimension_numbers<[1], [0], [0], [1], [0, 0, 1, 1], [], []>} : vector<8x128xf32>, vector<128x128xf32>, vector<8x128xf32> -> vector<8x128xf32>
    %13 = vector.broadcast %4 : vector<1x128xf32> to vector<8x128xf32>
    %14 = arith.addf %12, %13 : vector<8x128xf32>
    %cst_10 = arith.constant 0.000000e+00 : f32
    %15 = vector.broadcast %cst_10 : f32 to vector<8x128xf32>
    %16 = arith.maximumf %14, %15 : vector<8x128xf32>
    %cst_11 = arith.constant dense<0.000000e+00> : vector<8x128xf32>
    %17 = tpu.matmul %16, %5, %cst_11 {dimension_numbers = #tpu.dot_dimension_numbers<[1], [0], [0], [1], [0, 0, 1, 1], [], []>} : vector<8x128xf32>, vector<128x128xf32>, vector<8x128xf32> -> vector<8x128xf32>
    %18 = vector.broadcast %6 : vector<1x128xf32> to vector<8x128xf32>
    %19 = arith.addf %17, %18 : vector<8x128xf32>
    %c0_12 = arith.constant 0 : index
    %c0_13 = arith.constant 0 : index
    %20 = vector.load %arg3[%c0_12, %c0_13] : memref<8x128xf32, #tpu.memory_space<vmem>>, vector<8x128xf32>
    tpu.vector_store %arg3[%c0_12, %c0_13], %19 {strides = array<i32>} : memref<8x128xf32, #tpu.memory_space<vmem>>, vector<8x128xf32>,
    return
  }
  func.func @transform_0(%arg0: i32) -> (i32, i32) {
    %c0_i32 = arith.constant 0 : i32
    %c0_i32_0 = arith.constant 0 : i32
    return %arg0, %c0_i32 : i32, i32
  }
  func.func @transform_1(%arg0: i32) -> (i32, i32) {
    %c0_i32 = arith.constant 0 : i32
    %c0_i32_0 = arith.constant 0 : i32
    %c0_i32_1 = arith.constant 0 : i32
    return %c0_i32, %c0_i32_0 : i32, i32
  }
  func.func @transform_2(%arg0: i32) -> (i32, i32) {
    %c0_i32 = arith.constant 0 : i32
    %c0_i32_0 = arith.constant 0 : i32
    return %arg0, %c0_i32 : i32, i32
  }
}

</mosaic_0001>

<bundles_post_ra>
// kernel: tpu_custom_call.1
= control target key start
LH: loop header
LB: loop body
LE: loop exit
PB: predicated region body
PF: predicated region fallthrough
CT: control target
= control target key end

     0   :  { %7 = vsyncpa [#allocation3], 0  ;;  %s283_s0 = inlined_call_operand.hbm [shape: f32[8,8], index: 0, kind: input, shape index: {}]   ;;  %s284_s1 = inlined_call_operand.hbm [shape: f32[288,128], index: 1, kind: input, shape index: {}]   ;;  %s285_s2 = inlined_call_operand.hbm [shape: f32[8,128], index: 2, kind: output, shape index: {}]  }
   0x1   :  { %8 = vsyncpa [#allocation6], 0 }
   0x2   :  { %9 = vsyncpa [#allocation4], 0  ;;  %s15_s11 = sshll.u32 %s283_s0, 4  ;;  %s254_s12 = smov [#allocation2]   ;;  %s16_s11 = int_to_ptr.hbm [resolvable:$true] %s15_s11 }
   0x3   :  { %s17_s13 = sshll.u32 %s254_s12, 4  ;;  %s25_s16 = sshll.u32 %s284_s1, 4  ;;  %s18_s13 = int_to_ptr.vmem [resolvable:$true] %s17_s13  ;;  %s26_s16 = int_to_ptr.hbm [resolvable:$true] %s25_s16 }
   0x4   :  { %20 = dma.hbm_to_vmem [thread:$0]  %s16_s11, 128, %s18_s13, [#allocation3]  }
   0x5   :  { %s255_s17 = smov [#allocation5]   ;;  %s256_s19 = smov 128  }
   0x6   :  { %s27_s18 = sshll.u32 %s255_s17, 4  ;;  %s257_s20 = smov 8   ;;  %s28_s18 = int_to_ptr.vmem [resolvable:$true] %s27_s18 }
   0x7   :  { %33 = dma.hbm_to_vmem [thread:$0]  %s26_s16, 4608, %s28_s18, [#allocation6], %s256_s19, %s256_s19, %s257_s20  }
   0x8   :  { %248 = dma.done.wait [#allocation3], 128  }
   0x9   :  { %249 = vsyncadd [#allocation3], 4294967168 }
   0xa   :  { %250 = dma.done.wait [#allocation6], 4608  }
   0xb   :  { %251 = vsyncadd [#allocation6], 4294962688  ;;  %vm80_vm0 = vcmask 64512   ;;  %v43_v0 = vld [vmem:[#allocation5] sm:$0xff]  ;;  %v42_v1 = vld [vmem:[#allocation2] sm:$0xff]  ;;  %s258_s0 = smov [#allocation7]  }
   0xc   :  { %v60_v2 = vld [vmem:[#allocation5 + $0x88] sm:$0xff]  ;;  %99 = vmatpush.msra.mxu0 %v43_v0  ;;  %v59_v3 = vld [vmem:[#allocation5 + $0x80] sm:$0xff]  ;;  %v58_v4 = vld [vmem:[#allocation5 + $0x78] sm:$0xff]  ;;  %s154_s1 = sshll.u32 %s258_s0, 4  ;;  %s156_s23 = sshll.u32 %s285_s2, 4  ;;  %s155_s1 = int_to_ptr.vmem [resolvable:$true] %s154_s1  ;;  %s157_s23 = int_to_ptr.hbm [resolvable:$true] %s156_s23 }
   0xd   :  { %106 = vmatpush.msra.mxu1 %v60_v2  ;;  %167 = vmatmul.msk.f32.vlgmr.msra.gmra.mxu0 %vm80_vm0, %v42_v1  ;;  %v57_v5 = vld [vmem:[#allocation5 + $0x70] sm:$0xff]  ;;  %v56_v6 = vld [vmem:[#allocation5 + $0x68] sm:$0xff]  ;;  %v55_v7 = vld [vmem:[#allocation5 + $0x60] sm:$0xff] }
   0xe   :  { %v54_v8 = vld [vmem:[#allocation5 + $0x58] sm:$0xff]  ;;  %v53_v9 = vld [vmem:[#allocation5 + $0x50] sm:$0xff]  ;;  %v52_v10 = vld [vmem:[#allocation5 + $0x48] sm:$0xff] }
   0xf   :  { %107 = vmatpush.msra.mxu1 %v59_v3  ;;  %v51_v11 = vld [vmem:[#allocation5 + $0x40] sm:$0xff]  ;;  %v50_v12 = vld [vmem:[#allocation5 + $0x38] sm:$0xff]  ;;  %v49_v13 = vld [vmem:[#allocation5 + $0x30] sm:$0xff] }
  0x10   :  { %v48_v14 = vld [vmem:[#allocation5 + $0x28] sm:$0xff]  ;;  %v47_v15 = vld [vmem:[#allocation5 + $0x20] sm:$0xff]  ;;  %v46_v16 = vld [vmem:[#allocation5 + $0x18] sm:$0xff] }
  0x11   :  { %108 = vmatpush.msra.mxu1 %v58_v4  ;;  %v45_v17 = vld [vmem:[#allocation5 + $0x10] sm:$0xff]  ;;  %v76_v19 = vld [vmem:[#allocation5 + $0x108] sm:$0xff]  ;;  %v75_v20 = vld [vmem:[#allocation5 + $0x100] sm:$0xff] }
  0x12   :  { %v77_v18 = vld [vmem:[#allocation5 + $0x110] sm:$0xff]  ;;  %v74_v21 = vld [vmem:[#allocation5 + $0xf8] sm:$0xff]  ;;  %v72_v23 = vld [vmem:[#allocation5 + $0xe8] sm:$0xff] }
  0x13   :  { %109 = vmatpush.msra.mxu1 %v57_v5  ;;  %128 = vmatpush.msra.mxu2 %v77_v18  ;;  %v73_v22 = vld [vmem:[#allocation5 + $0xf0] sm:$0xff]  ;;  %v71_v24 = vld [vmem:[#allocation5 + $0xe0] sm:$0xff]  ;;  %v70_v25 = vld [vmem:[#allocation5 + $0xd8] sm:$0xff] }
  0x14   :  { %v69_v26 = vld [vmem:[#allocation5 + $0xd0] sm:$0xff]  ;;  %v68_v27 = vld [vmem:[#allocation5 + $0xc8] sm:$0xff]  ;;  %v67_v28 = vld [vmem:[#allocation5 + $0xc0] sm:$0xff] }
  0x15   :  { %110 = vmatpush.msra.mxu1 %v56_v6  ;;  %129 = vmatpush.msra.mxu2 %v76_v19  ;;  %v66_v29 = vld [vmem:[#allocation5 + $0xb8] sm:$0xff]  ;;  %v65_v30 = vld [vmem:[#allocation5 + $0xb0] sm:$0xff]  ;;  %v173_v31 = vld [vmem:[#allocation5 + $0x8] ss:$0 sm:$0xff] }
  0x16   :  { %v64_v35 = vld [vmem:[#allocation5 + $0xa8] sm:$0xff]  ;;  %v63_v36 = vld [vmem:[#allocation5 + $0xa0] sm:$0xff]  ;;  %v62_v37 = vld [vmem:[#allocation5 + $0x98] sm:$0xff] }
  0x17   :  { %111 = vmatpush.msra.mxu1 %v55_v7  ;;  %130 = vmatpush.msra.mxu2 %v75_v20  ;;  %v174_v38 = vld [vmem:[#allocation5 + $0x90] ss:$0 sm:$0xff]  ;;  %v175_v42 = vld [vmem:[#allocation5 + $0x118] ss:$0 sm:$0xff] }
  0x19   :  { %112 = vmatpush.msra.mxu1 %v54_v8  ;;  %131 = vmatpush.msra.mxu2 %v74_v21 }
  0x1b   :  { %113 = vmatpush.msra.mxu1 %v53_v9  ;;  %132 = vmatpush.msra.mxu2 %v73_v22 }
  0x1d   :  { %114 = vmatpush.msra.mxu1 %v52_v10  ;;  %133 = vmatpush.msra.mxu2 %v72_v23 }
  0x1f   :  { %115 = vmatpush.msra.mxu1 %v51_v11  ;;  %134 = vmatpush.msra.mxu2 %v71_v24 }
  0x21   :  { %116 = vmatpush.msra.mxu1 %v50_v12  ;;  %135 = vmatpush.msra.mxu2 %v70_v25 }
  0x23   :  { %117 = vmatpush.msra.mxu1 %v49_v13  ;;  %136 = vmatpush.msra.mxu2 %v69_v26 }
  0x25   :  { %118 = vmatpush.msra.mxu1 %v48_v14  ;;  %137 = vmatpush.msra.mxu2 %v68_v27 }
  0x27   :  { %119 = vmatpush.msra.mxu1 %v47_v15  ;;  %138 = vmatpush.msra.mxu2 %v67_v28 }
  0x29   :  { %120 = vmatpush.msra.mxu1 %v46_v16  ;;  %139 = vmatpush.msra.mxu2 %v66_v29 }
  0x2b   :  { %121 = vmatpush.msra.mxu1 %v45_v17  ;;  %140 = vmatpush.msra.mxu2 %v65_v30 }
  0x2d   :  { %141 = vmatpush.msra.mxu2 %v64_v35 }
  0x2f   :  { %142 = vmatpush.msra.mxu2 %v63_v36 }
  0x31   :  { %143 = vmatpush.msra.mxu2 %v62_v37 }
  0x8a   :  { %v101_v32 = vpop.f32.mrf.mxu0 }
  0x8b   :  { %v102_v33 = vadd.f32 %v173_v31, %v101_v32 }
  0x8d   :  { %v104_v34 = vmax.f32 %v102_v33, 0.0 }
  0x8f   :  { %122 = vmatmul.f32.vlgmr.msra.gmra.mxu1 %v104_v34 }
 0x10c   :  { %v123_v39 = vpop.f32.mrf.mxu1 }
 0x10d   :  { %v124_v40 = vadd.f32 %v174_v38, %v123_v39 }
 0x10f   :  { %v126_v41 = vmax.f32 %v124_v40, 0.0 }
 0x111   :  { %144 = vmatmul.f32.vlgmr.msra.gmra.mxu2 %v126_v41 }
 0x194   :  { %v145_v43 = vpop.f32.mrf.mxu2 }
 0x195   :  { %v146_v44 = vadd.f32 %v175_v42, %v145_v43 }
 0x197   :  { %148 = vst [vmem:[#allocation7] sm:$0xff] %v146_v44 }
 0x198   :  { %159 = dma.vmem_to_hbm [thread:$0]  %s155_s1, 128, %s157_s23, [#allocation4]  }
 0x199   :  { %252 = dma.done.wait [#allocation4], 128  }
 0x19a   :  { %253 = vsyncadd [#allocation4], 4294967168 }
 0x19b   :  { %164 = vsyncpa [#allocation3], 1 }
 0x19c   :  { %165 = vsyncpa [#allocation6], 1 }
 0x19d   :  { %166 = vsyncpa [#allocation4], 1 }

</bundles_post_ra>
